<compile_context>
chip_gen: v7x
topology: tpu7x:2x2x1
jax: 0.10.0
libtpu: 0.0.40
codegen_flags: <defaults>
</compile_context>

<pallas_src>
import functools

import jax
import jax.numpy as jnp
from jax.experimental import pallas as pl
from jax.experimental.pallas import tpu as pltpu

HIDDEN1 = 1024
HIDDEN2 = 256
LANE = 128
SUBLANE = 8


def _round_up(x, m):
    return ((x + m - 1) // m) * m


def _mlp_kernel(x_ref, w1_ref, b1_ref, w2_ref, b2_ref, w3_ref, b3_ref, o_ref):
    # x tile + weights are bf16 in VMEM; MXU matmuls accumulate in f32,
    # bias add + ReLU run on the VPU in f32, inter-layer activations in bf16.
    x = x_ref[...]  # (TB, IN_PAD) bf16

    h1 = jnp.dot(x, w1_ref[...], preferred_element_type=jnp.float32) + b1_ref[...]
    h1 = jnp.maximum(h1, 0.0).astype(jnp.bfloat16)

    h2 = jnp.dot(h1, w2_ref[...], preferred_element_type=jnp.float32) + b2_ref[...]
    h2 = jnp.maximum(h2, 0.0).astype(jnp.bfloat16)

    out = jnp.dot(h2, w3_ref[...], preferred_element_type=jnp.float32) + b3_ref[...]
    o_ref[...] = out.astype(o_ref.dtype)  # (TB, OUT_PAD) lane-dense bf16 store


def _vmem_budget_bytes():
    """Per-generation VMEM budget: ~3/4 of capacity, capped at 100 MiB.

    v5e/v6e (128 MiB) -> 96 MiB; v7x (64 MiB per TC) -> 48 MiB.
    """
    default_cap = 64 * 1024 * 1024  # conservative: v7x per-TensorCore VMEM
    try:
        info = pltpu.get_tpu_info()
        cap = int(getattr(info, "vmem_capacity_bytes", default_cap))
    except Exception:
        cap = default_cap
    return min(cap * 3 // 4, 100 * 1024 * 1024)


def _vmem_usage_bytes(tb, in_pad, out_pad):
    """Rough live-VMEM estimate for a given batch tile."""
    weights = (in_pad * HIDDEN1 + HIDDEN1 * HIDDEN2 + HIDDEN2 * out_pad) * 2  # bf16, 1 copy
    biases = (HIDDEN1 + HIDDEN2 + out_pad) * 4                                # f32,  1 copy
    x_tiles = 2 * tb * in_pad * 2                                             # double-buffered bf16
    out_tiles = 2 * tb * out_pad * 2                                          # double-buffered bf16
    inter = tb * (HIDDEN1 + HIDDEN2) * (4 + 2) + tb * out_pad * 4             # f32 + bf16 activations
    return weights + biases + x_tiles + out_tiles + inter


def net_wolf_forward(x, params, *, output_size, block_b=1024):
    """x: (B, input_size) (any float dtype; bf16 lane-padded preferred).

    params: dict of w1,b1,w2,b2,w3,b3 with weights (in_features, out_features),
    already lane-padded by init_params. Returns (B, output_size) f32.
    """
    w1, b1 = params["w1"], params["b1"]
    w2, b2 = params["w2"], params["b2"]
    w3, b3 = params["w3"], params["b3"]

    B = x.shape[0]
    in_pad = w1.shape[0]    # input_size rounded up to a multiple of 128
    out_pad = w3.shape[1]   # output_size rounded up to a multiple of 128

    # Fast path: if the caller already provides bf16, lane-padded x these are
    # no-ops (avoids an extra HBM read/write pass over x every call).
    xb = x if x.dtype == jnp.bfloat16 else x.astype(jnp.bfloat16)
    if xb.shape[1] != in_pad:
        xb = jnp.pad(xb, ((0, 0), (0, in_pad - xb.shape[1])))

    vmem_budget = _vmem_budget_bytes()

    # Batch tile: multiple of 8 sublanes, large by default (amortizes the
    # ~0.35us/step pipeline overhead), but (a) >= 2 grid steps when B allows it
    # so v7x's second TensorCore gets work, and (b) shrunk until the live VMEM
    # estimate fits this generation's budget.
    tb = min(block_b, _round_up(B, SUBLANE))
    if B > SUBLANE:
        tb = min(tb, _round_up((B + 1) // 2, SUBLANE))
    while tb > SUBLANE and _vmem_usage_bytes(tb, in_pad, out_pad) > vmem_budget:
        tb = _round_up(tb // 2, SUBLANE)
    # TODO(synk): for very large input_size where w1 alone exceeds the VMEM
    # budget even single-buffered, add a K grid axis with an f32 accumulator
    # instead of keeping w1 fully resident.

    b_pad = _round_up(B, tb)
    if b_pad != B:
        xb = jnp.pad(xb, ((0, b_pad - B), (0, 0)))

    grid = (b_pad // tb,)
    stream = lambda i: (i, 0)                                   # x / out: per batch tile
    vmem_res = pl.BlockSpec(memory_space=pltpu.MemorySpace.VMEM)  # weights: 1 resident copy

    flops = 2 * b_pad * (in_pad * HIDDEN1 + HIDDEN1 * HIDDEN2 + HIDDEN2 * out_pad)
    bytes_accessed = (
        b_pad * in_pad * 2                                                  # x read (bf16)
        + (in_pad * HIDDEN1 + HIDDEN1 * HIDDEN2 + HIDDEN2 * out_pad) * 2    # weights (bf16)
        + (HIDDEN1 + HIDDEN2 + out_pad) * 4                                 # biases (f32)
        + b_pad * out_pad * 2                                               # out write (bf16)
    )

    out = pl.pallas_call(
        _mlp_kernel,
        out_shape=jax.ShapeDtypeStruct((b_pad, out_pad), jnp.bfloat16),
        grid=grid,
        in_specs=[
            pl.BlockSpec((tb, in_pad), stream),  # x streamed per batch tile
            vmem_res,  # w1
            vmem_res,  # b1
            vmem_res,  # w2
            vmem_res,  # b2
            vmem_res,  # w3 (lane-padded)
            vmem_res,  # b3 (lane-padded)
        ],
        out_specs=pl.BlockSpec((tb, out_pad), stream),
        compiler_params=pltpu.CompilerParams(
            dimension_semantics=("parallel",),   # megacore on v7x, no-op elsewhere
            vmem_limit_bytes=vmem_budget,
        ),
        cost_estimate=pl.CostEstimate(
            flops=flops, transcendentals=0, bytes_accessed=bytes_accessed
        ),
    )(xb, w1, b1, w2, b2, w3, b3)

    return out[:B, :output_size].astype(jnp.float32)


def init_params(key, input_size, output_size):
    """Mirror nn.Linear's uniform(-1/sqrt(fan_in), 1/sqrt(fan_in)) init.

    Weights stored (in_features, out_features) in bf16 and pre-padded to
    128-lane multiples (w1 rows, w3/b3 cols) so the forward pass does no
    per-call weight copies. Biases stay f32. Zero padding is exact: padded
    x columns hit zero w1 rows and padded output columns are sliced off.
    """
    in_pad = _round_up(max(input_size, LANE), LANE)
    out_pad = _round_up(max(output_size, LANE), LANE)

    def linear(k, fan_in, fan_out, fan_in_pad, fan_out_pad):
        kw, kb = jax.random.split(k)
        bound = 1.0 / jnp.sqrt(fan_in)
        w = jax.random.uniform(kw, (fan_in, fan_out), jnp.float32, -bound, bound)
        b = jax.random.uniform(kb, (1, fan_out), jnp.float32, -bound, bound)
        w = jnp.pad(w, ((0, fan_in_pad - fan_in), (0, fan_out_pad - fan_out)))
        b = jnp.pad(b, ((0, 0), (0, fan_out_pad - fan_out)))
        return w.astype(jnp.bfloat16), b

    k1, k2, k3 = jax.random.split(key, 3)
    w1, b1 = linear(k1, input_size, HIDDEN1, in_pad, HIDDEN1)
    w2, b2 = linear(k2, HIDDEN1, HIDDEN2, HIDDEN1, HIDDEN2)
    w3, b3 = linear(k3, HIDDEN2, output_size, HIDDEN2, out_pad)
    return {"w1": w1, "b1": b1, "w2": w2, "b2": b2, "w3": w3, "b3": b3}


def _reference(x, p, output_size):
    # Pure-JAX reference following the same bf16-weights / f32-accumulate recipe.
    f32 = jnp.float32
    w1 = p["w1"].astype(f32)
    xb = x.astype(jnp.bfloat16).astype(f32)
    xb = jnp.pad(xb, ((0, 0), (0, w1.shape[0] - xb.shape[1])))
    h1 = jnp.maximum(xb @ w1 + p["b1"].astype(f32), 0.0)
    h1 = h1.astype(jnp.bfloat16).astype(f32)
    h2 = jnp.maximum(h1 @ p["w2"].astype(f32) + p["b2"].astype(f32), 0.0)
    h2 = h2.astype(jnp.bfloat16).astype(f32)
    out = h2 @ p["w3"].astype(f32) + p["b3"].astype(f32)
    return out[:, :output_size]


if __name__ == "__main__":
    INPUT_SIZE = 32
    OUTPUT_SIZE = 16
    BATCH = 8

    key = jax.random.PRNGKey(0)
    kx, kp = jax.random.split(key)
    x = jax.random.normal(kx, (BATCH, INPUT_SIZE), jnp.float32)
    params = init_params(kp, INPUT_SIZE, OUTPUT_SIZE)

    fwd = jax.jit(functools.partial(net_wolf_forward, output_size=OUTPUT_SIZE))
    out = jax.block_until_ready(fwd(x, params))

    ref = _reference(x, params, OUTPUT_SIZE)
    assert out.shape == (BATCH, OUTPUT_SIZE), out.shape
    assert jnp.allclose(out, ref, atol=1e-2, rtol=1e-2), "mismatch vs reference"

    print("KERNEL_OK")
</pallas_src>

<mosaic_0001>
module attributes {stable_mosaic.version = 11 : i64} {
  func.func @_mlp_kernel(%arg0: i32, %arg1: memref<8x128xbf16, #tpu.memory_space<vmem>>, %arg2: memref<128x1024xbf16, #tpu.memory_space<vmem>>, %arg3: memref<1x1024xf32, #tpu.memory_space<vmem>>, %arg4: memref<1024x256xbf16, #tpu.memory_space<vmem>>, %arg5: memref<1x256xf32, #tpu.memory_space<vmem>>, %arg6: memref<256x128xbf16, #tpu.memory_space<vmem>>, %arg7: memref<1x128xf32, #tpu.memory_space<vmem>>, %arg8: memref<8x128xbf16, #tpu.memory_space<vmem>>) attributes {dimension_semantics = [#tpu.dimension_semantics<parallel>], iteration_bounds = array<i64: 1>, scalar_prefetch = 0 : i64, scratch_operands = 0 : i64, tpu.core_type = #tpu.core_type<tc>, window_params = [{transform_indices = @transform_0, window_bounds = array<i64: 8, 128>}, {pipeline_mode = #tpu.pipeline_mode<synchronous>, transform_indices = @transform_1, window_bounds = array<i64: 128, 1024>}, {pipeline_mode = #tpu.pipeline_mode<synchronous>, transform_indices = @transform_2, window_bounds = array<i64: 1, 1024>}, {pipeline_mode = #tpu.pipeline_mode<synchronous>, transform_indices = @transform_3, window_bounds = array<i64: 1024, 256>}, {pipeline_mode = #tpu.pipeline_mode<synchronous>, transform_indices = @transform_4, window_bounds = array<i64: 1, 256>}, {pipeline_mode = #tpu.pipeline_mode<synchronous>, transform_indices = @transform_5, window_bounds = array<i64: 256, 128>}, {pipeline_mode = #tpu.pipeline_mode<synchronous>, transform_indices = @transform_6, window_bounds = array<i64: 1, 128>}, {transform_indices = @transform_7, window_bounds = array<i64: 8, 128>}]} {
    %c0 = arith.constant 0 : index
    %c0_0 = arith.constant 0 : index
    %0 = vector.load %arg1[%c0, %c0_0] : memref<8x128xbf16, #tpu.memory_space<vmem>>, vector<8x128xbf16>
    %c0_1 = arith.constant 0 : index
    %c0_2 = arith.constant 0 : index
    %1 = vector.load %arg2[%c0_1, %c0_2] : memref<128x1024xbf16, #tpu.memory_space<vmem>>, vector<128x1024xbf16>
    %cst = arith.constant dense<0.000000e+00> : vector<8x1024xf32>
    %2 = tpu.matmul %0, %1, %cst {dimension_numbers = #tpu.dot_dimension_numbers<[1], [0], [0], [1], [0, 0, 1, 1], [], []>} : vector<8x128xbf16>, vector<128x1024xbf16>, vector<8x1024xf32> -> vector<8x1024xf32>
    %c0_3 = arith.constant 0 : index
    %c0_4 = arith.constant 0 : index
    %3 = vector.load %arg3[%c0_3, %c0_4] : memref<1x1024xf32, #tpu.memory_space<vmem>>, vector<1x1024xf32>
    %4 = vector.broadcast %3 : vector<1x1024xf32> to vector<8x1024xf32>
    %5 = arith.addf %2, %4 : vector<8x1024xf32>
    %cst_5 = arith.constant 0.000000e+00 : f32
    %6 = vector.broadcast %cst_5 : f32 to vector<8x1024xf32>
    %7 = arith.maximumf %5, %6 : vector<8x1024xf32>
    %8 = arith.truncf %7 : vector<8x1024xf32> to vector<8x1024xbf16>
    %c0_6 = arith.constant 0 : index
    %c0_7 = arith.constant 0 : index
    %9 = vector.load %arg4[%c0_6, %c0_7] : memref<1024x256xbf16, #tpu.memory_space<vmem>>, vector<1024x256xbf16>
    %cst_8 = arith.constant dense<0.000000e+00> : vector<8x256xf32>
    %10 = tpu.matmul %8, %9, %cst_8 {dimension_numbers = #tpu.dot_dimension_numbers<[1], [0], [0], [1], [0, 0, 1, 1], [], []>} : vector<8x1024xbf16>, vector<1024x256xbf16>, vector<8x256xf32> -> vector<8x256xf32>
    %c0_9 = arith.constant 0 : index
    %c0_10 = arith.constant 0 : index
    %11 = vector.load %arg5[%c0_9, %c0_10] : memref<1x256xf32, #tpu.memory_space<vmem>>, vector<1x256xf32>
    %12 = vector.broadcast %11 : vector<1x256xf32> to vector<8x256xf32>
    %13 = arith.addf %10, %12 : vector<8x256xf32>
    %cst_11 = arith.constant 0.000000e+00 : f32
    %14 = vector.broadcast %cst_11 : f32 to vector<8x256xf32>
    %15 = arith.maximumf %13, %14 : vector<8x256xf32>
    %16 = arith.truncf %15 : vector<8x256xf32> to vector<8x256xbf16>
    %c0_12 = arith.constant 0 : index
    %c0_13 = arith.constant 0 : index
    %17 = vector.load %arg6[%c0_12, %c0_13] : memref<256x128xbf16, #tpu.memory_space<vmem>>, vector<256x128xbf16>
    %cst_14 = arith.constant dense<0.000000e+00> : vector<8x128xf32>
    %18 = tpu.matmul %16, %17, %cst_14 {dimension_numbers = #tpu.dot_dimension_numbers<[1], [0], [0], [1], [0, 0, 1, 1], [], []>} : vector<8x256xbf16>, vector<256x128xbf16>, vector<8x128xf32> -> vector<8x128xf32>
    %c0_15 = arith.constant 0 : index
    %c0_16 = arith.constant 0 : index
    %19 = vector.load %arg7[%c0_15, %c0_16] : memref<1x128xf32, #tpu.memory_space<vmem>>, vector<1x128xf32>
    %20 = vector.broadcast %19 : vector<1x128xf32> to vector<8x128xf32>
    %21 = arith.addf %18, %20 : vector<8x128xf32>
    %22 = arith.truncf %21 : vector<8x128xf32> to vector<8x128xbf16>
    %c0_17 = arith.constant 0 : index
    %c0_18 = arith.constant 0 : index
    %23 = vector.load %arg8[%c0_17, %c0_18] : memref<8x128xbf16, #tpu.memory_space<vmem>>, vector<8x128xbf16>
    tpu.vector_store %arg8[%c0_17, %c0_18], %22 {strides = array<i32>} : memref<8x128xbf16, #tpu.memory_space<vmem>>, vector<8x128xbf16>,
    return
  }
  func.func @transform_0(%arg0: i32) -> (i32, i32) {
    %c0_i32 = arith.constant 0 : i32
    %c0_i32_0 = arith.constant 0 : i32
    return %arg0, %c0_i32 : i32, i32
  }
  func.func @transform_1(%arg0: i32) -> (i32, i32) {
    %c0_i32 = arith.constant 0 : i32
    %c0_i32_0 = arith.constant 0 : i32
    %c0_i32_1 = arith.constant 0 : i32
    return %c0_i32, %c0_i32_0 : i32, i32
  }
  func.func @transform_2(%arg0: i32) -> (i32, i32) {
    %c0_i32 = arith.constant 0 : i32
    %c0_i32_0 = arith.constant 0 : i32
    %c0_i32_1 = arith.constant 0 : i32
    return %c0_i32, %c0_i32_0 : i32, i32
  }
  func.func @transform_3(%arg0: i32) -> (i32, i32) {
    %c0_i32 = arith.constant 0 : i32
    %c0_i32_0 = arith.constant 0 : i32
    %c0_i32_1 = arith.constant 0 : i32
    return %c0_i32, %c0_i32_0 : i32, i32
  }
  func.func @transform_4(%arg0: i32) -> (i32, i32) {
    %c0_i32 = arith.constant 0 : i32
    %c0_i32_0 = arith.constant 0 : i32
    %c0_i32_1 = arith.constant 0 : i32
    return %c0_i32, %c0_i32_0 : i32, i32
  }
  func.func @transform_5(%arg0: i32) -> (i32, i32) {
    %c0_i32 = arith.constant 0 : i32
    %c0_i32_0 = arith.constant 0 : i32
    %c0_i32_1 = arith.constant 0 : i32
    return %c0_i32, %c0_i32_0 : i32, i32
  }
  func.func @transform_6(%arg0: i32) -> (i32, i32) {
    %c0_i32 = arith.constant 0 : i32
    %c0_i32_0 = arith.constant 0 : i32
    %c0_i32_1 = arith.constant 0 : i32
    return %c0_i32, %c0_i32_0 : i32, i32
  }
  func.func @transform_7(%arg0: i32) -> (i32, i32) {
    %c0_i32 = arith.constant 0 : i32
    %c0_i32_0 = arith.constant 0 : i32
    return %arg0, %c0_i32 : i32, i32
  }
}

</mosaic_0001>

<bundles_post_ra>
// kernel: net_wolf_forward.1
= control target key start
LH: loop header
LB: loop body
LE: loop exit
PB: predicated region body
PF: predicated region fallthrough
CT: control target
= control target key end

     0   :  { %12 = vsyncpa [#allocation3], 0  ;;  %s2482_s0 = inlined_call_operand.vmem [shape: bf16[8,128], index: 0, kind: input, shape index: {}]   ;;  %s2483_s1 = inlined_call_operand.hbm [shape: bf16[128,1024], index: 1, kind: input, shape index: {}]   ;;  %s2484_s2 = inlined_call_operand.vmem [shape: f32[1,1024], index: 2, kind: input, shape index: {}]   ;;  %s2485_s3 = inlined_call_operand.hbm [shape: bf16[1024,256], index: 3, kind: input, shape index: {}]   ;;  %s2486_s4 = inlined_call_operand.vmem [shape: f32[1,256], index: 4, kind: input, shape index: {}]   ;;  %s2487_s5 = inlined_call_operand.hbm [shape: bf16[256,128], index: 5, kind: input, shape index: {}]   ;;  %s2488_s6 = inlined_call_operand.vmem [shape: f32[1,128], index: 6, kind: input, shape index: {}]   ;;  %s2489_s7 = inlined_call_operand.vmem [shape: bf16[8,128], index: 7, kind: output, shape index: {}]  }
   0x1   :  { %13 = vsyncpa [#allocation5], 0  ;;  %s2337_s24 = smov [#allocation4]   ;;  %s2267_s28 = scalar_lea.hbm %s2485_s3, 16384 }
   0x2   :  { %s35_s25 = sshll.u32 %s2337_s24, 4  ;;  %p2268_p0 = scmp.ne.s32.totalorder %s2485_s3, %s2267_s28  ;;  %s36_s25 = int_to_ptr.vmem [resolvable:$true] %s35_s25 }
   0x3   :  { %p2271_p1 = scmp.lt.u32.totalorder %s2267_s28, %s2485_s3 }
   0x5   :  { %p2273_p2 = pnand %p2271_p1, %p2268_p0 }
   0x7   :  { %2276 = shalt.err (!%p2273_p2)
}
   0x8   :  { %s2277_s10 = scalar_lea.vmem %s36_s25, 16384  ;;  %p2282_p4 = scmp.lt.s32.totalorder %s36_s25, %s36_s25 }
   0x9   :  { %p2278_p3 = scmp.ne.s32.totalorder %s36_s25, %s2277_s10  ;;  %p2283_p5 = scmp.lt.s32.totalorder %s2277_s10, %s2277_s10 }
   0xb   :  { %p2284_p6 = por %p2283_p5, %p2282_p4 }
   0xd   :  { %p2285_p7 = pnand %p2284_p6, %p2278_p3 }
   0xf   :  { %2288 = shalt.err (!%p2285_p7)
}
  0x10   :  { %s2338_s11 = smov 128   ;;  %s2339_s12 = smov 8  }
  0x11   :  { %41 = dma.hbm_to_vmem [thread:$0]  %s2485_s3, 16384, %s36_s25, [#allocation5], %s2338_s11, %s2338_s11, %s2339_s12  }
  0x12   :  { %s2340_s15 = smov [#allocation2]   ;;  %s2289_s19 = scalar_lea.hbm %s2483_s1, 8192 }
  0x13   :  { %s21_s16 = sshll.u32 %s2340_s15, 4  ;;  %p2290_p8 = scmp.ne.s32.totalorder %s2483_s1, %s2289_s19  ;;  %s22_s16 = int_to_ptr.vmem [resolvable:$true] %s21_s16 }
  0x14   :  { %p2293_p9 = scmp.lt.u32.totalorder %s2289_s19, %s2483_s1 }
  0x16   :  { %p2295_p10 = pnand %p2293_p9, %p2290_p8 }
  0x18   :  { %2298 = shalt.err (!%p2295_p10)
}
  0x19   :  { %s2299_s24 = scalar_lea.vmem %s22_s16, 8192  ;;  %p2304_p12 = scmp.lt.s32.totalorder %s22_s16, %s22_s16 }
  0x1a   :  { %p2300_p11 = scmp.ne.s32.totalorder %s22_s16, %s2299_s24  ;;  %p2305_p13 = scmp.lt.s32.totalorder %s2299_s24, %s2299_s24 }
  0x1c   :  { %p2306_p0 = por %p2305_p13, %p2304_p12 }
  0x1e   :  { %p2307_p1 = pnand %p2306_p0, %p2300_p11 }
  0x20   :  { %2310 = shalt.err (!%p2307_p1)
}
  0x21   :  { %s2341_s3 = smov 512   ;;  %s2342_s25 = smov 32  }
  0x22   :  { %27 = dma.hbm_to_vmem [thread:$0]  %s2483_s1, 8192, %s22_s16, [#allocation3], %s2341_s3, %s2341_s3, %s2342_s25  }
  0x23   :  { %s2343_s28 = smov [#allocation6]   ;;  %s2311_s9 = scalar_lea.hbm %s2487_s5, 2048 }
  0x24   :  { %s49_s29 = sshll.u32 %s2343_s28, 4  ;;  %p2312_p2 = scmp.ne.s32.totalorder %s2487_s5, %s2311_s9  ;;  %s50_s29 = int_to_ptr.vmem [resolvable:$true] %s49_s29 }
  0x25   :  { %p2315_p3 = scmp.lt.u32.totalorder %s2311_s9, %s2487_s5 }
  0x27   :  { %p2317_p4 = pnand %p2315_p3, %p2312_p2 }
  0x29   :  { %2320 = shalt.err (!%p2317_p4)
}
  0x2a   :  { %s2321_s14 = scalar_lea.vmem %s50_s29, 2048  ;;  %p2326_p6 = scmp.lt.s32.totalorder %s50_s29, %s50_s29 }
  0x2b   :  { %p2322_p5 = scmp.ne.s32.totalorder %s50_s29, %s2321_s14  ;;  %p2327_p7 = scmp.lt.s32.totalorder %s2321_s14, %s2321_s14 }
  0x2d   :  { %p2328_p8 = por %p2327_p7, %p2326_p6 }
  0x2f   :  { %p2329_p9 = pnand %p2328_p8, %p2322_p5 }
  0x31   :  { %2332 = shalt.err (!%p2329_p9)
}
  0x32   :  { %s2344_s1 = smov 64   ;;  %s2345_s15 = smov 4  }
  0x33   :  { %55 = dma.hbm_to_vmem [thread:$0]  %s2487_s5, 2048, %s50_s29, [#allocation5], %s2344_s1, %s2344_s1, %s2345_s15  }
  0x34   :  { %2333 = dma.done.wait [#allocation3], 8192  }
  0x35   :  { %2334 = vsyncadd [#allocation3], 4294959104 }
  0x36   :  { %2335 = dma.done.wait [#allocation5], 18432  }
  0x37   :  { %2336 = vsyncadd [#allocation5], 4294948864  ;;  %v2346_v0 = vmov 0   ;;  %v69_v1 = vld [vmem:[#allocation2] sm:$0xff]  ;;  %v71_v18 = vld [vmem:[#allocation2 + $0x10] sm:$0xff] }
  0x38   :  { %527 = vmatprep.mubr.bf16.mxu1 %v2346_v0  ;;  %609 = vmatprep.mubr.bf16.mxu0 %v2346_v0  ;;  %v73_v2 = vld [vmem:[#allocation2 + $0x20] sm:$0xff]  ;;  %v75_v19 = vld [vmem:[#allocation2 + $0x30] sm:$0xff]  ;;  %v70_v53 = vld [vmem:[#allocation2 + $0x8] sm:$0xff] }
  0x39   :  { %v77_v3 = vld [vmem:[#allocation2 + $0x40] sm:$0xff]  ;;  %v1807_v4 = vcombine.high %v69_v1, %v73_v2  ;;  %v1806_v5 = vcombine.low %v69_v1, %v73_v2  ;;  %v79_v20 = vld [vmem:[#allocation2 + $0x50] sm:$0xff]  ;;  %v1811_v22 = vcombine.high %v71_v18, %v75_v19  ;;  %v1810_v23 = vcombine.low %v71_v18, %v75_v19  ;;  %v74_v54 = vld [vmem:[#allocation2 + $0x28] sm:$0xff] }
  0x3a   :  { %v81_v6 = vld [vmem:[#allocation2 + $0x60] sm:$0xff]  ;;  %v83_v24 = vld [vmem:[#allocation2 + $0x70] sm:$0xff]  ;;  %v1809_v58 = vcombine.high %v70_v53, %v74_v54  ;;  %v78_v59 = vld [vmem:[#allocation2 + $0x48] sm:$0xff]  ;;  %v1808_v2 = vcombine.low %v70_v53, %v74_v54 }
  0x3b   :  { %v1815_v7 = vcombine.high %v77_v3, %v81_v6  ;;  %v85_v8 = vld [vmem:[#allocation2 + $0x80] sm:$0xff]  ;;  %495 = vmatprep.subr.bf16.mxu1 %v1807_v4  ;;  %v1814_v10 = vcombine.low %v77_v3, %v81_v6  ;;  %v1819_v26 = vcombine.high %v79_v20, %v83_v24  ;;  %v87_v27 = vld [vmem:[#allocation2 + $0x90] sm:$0xff]  ;;  %577 = vmatprep.subr.bf16.mxu0 %v1811_v22  ;;  %v82_v60 = vld [vmem:[#allocation2 + $0x68] sm:$0xff] }
  0x3c   :  { %v89_v9 = vld [vmem:[#allocation2 + $0xa0] sm:$0xff]  ;;  %496 = vmatpush1.bf16.msra.mxu1 %v1806_v5  ;;  %v91_v28 = vld [vmem:[#allocation2 + $0xb0] sm:$0xff]  ;;  %578 = vmatpush1.bf16.msra.mxu0 %v1810_v23  ;;  %v1818_v31 = vcombine.low %v79_v20, %v83_v24  ;;  %v1817_v3 = vcombine.high %v78_v59, %v82_v60  ;;  %v102_v19 = vld [vmem:[#allocation2 + $0x108] sm:$0xff] }
  0x3d   :  { %497 = vmatprep.subr.bf16.mxu1 %v1815_v7  ;;  %v1823_v11 = vcombine.high %v85_v8, %v89_v9  ;;  %v93_v12 = vld [vmem:[#allocation2 + $0xc0] sm:$0xff]  ;;  %v1822_v14 = vcombine.low %v85_v8, %v89_v9  ;;  %579 = vmatprep.subr.bf16.mxu0 %v1819_v26  ;;  %v1827_v33 = vcombine.high %v87_v27, %v91_v28  ;;  %v95_v35 = vld [vmem:[#allocation2 + $0xd0] sm:$0xff]  ;;  %v86_v7 = vld [vmem:[#allocation2 + $0x88] sm:$0xff] }
  0x3e   :  { %v97_v13 = vld [vmem:[#allocation2 + $0xe0] sm:$0xff]  ;;  %v99_v36 = vld [vmem:[#allocation2 + $0xf0] sm:$0xff]  ;;  %v1826_v39 = vcombine.low %v87_v27, %v91_v28  ;;  %v90_v8 = vld [vmem:[#allocation2 + $0xa8] sm:$0xff] }
  0x3f   :  { %v1831_v15 = vcombine.high %v93_v12, %v97_v13  ;;  %v101_v16 = vld [vmem:[#allocation2 + $0x100] sm:$0xff]  ;;  %v1830_v21 = vcombine.low %v93_v12, %v97_v13  ;;  %v1835_v41 = vcombine.high %v95_v35, %v99_v36  ;;  %v103_v43 = vld [vmem:[#allocation2 + $0x110] sm:$0xff]  ;;  %v1834_v47 = vcombine.low %v95_v35, %v99_v36  ;;  %v94_v13 = vld [vmem:[#allocation2 + $0xc8] sm:$0xff] }
  0x40   :  { %498 = vmatpush1.bf16.msra.mxu1 %v1814_v10  ;;  %v105_v17 = vld [vmem:[#allocation2 + $0x120] sm:$0xff]  ;;  %580 = vmatpush1.bf16.msra.mxu0 %v1818_v31  ;;  %v107_v44 = vld [vmem:[#allocation2 + $0x130] sm:$0xff]  ;;  %v1816_v10 = vcombine.low %v78_v59, %v82_v60  ;;  %v1825_v12 = vcombine.high %v86_v7, %v90_v8  ;;  %v106_v20 = vld [vmem:[#allocation2 + $0x128] sm:$0xff] }
  0x41   :  { %499 = vmatprep.subr.bf16.mxu1 %v1823_v11  ;;  %v1839_v25 = vcombine.high %v101_v16, %v105_v17  ;;  %v109_v29 = vld [vmem:[#allocation2 + $0x140] sm:$0xff]  ;;  %v1838_v32 = vcombine.low %v101_v16, %v105_v17  ;;  %581 = vmatprep.subr.bf16.mxu0 %v1827_v33  ;;  %v1843_v49 = vcombine.high %v103_v43, %v107_v44  ;;  %v111_v51 = vld [vmem:[#allocation2 + $0x150] sm:$0xff]  ;;  %v114_v26 = vld [vmem:[#allocation2 + $0x168] sm:$0xff] }
  0x42   :  { %v113_v30 = vld [vmem:[#allocation2 + $0x160] sm:$0xff]  ;;  %v115_v52 = vld [vmem:[#allocation2 + $0x170] sm:$0xff]  ;;  %v1842_v55 = vcombine.low %v103_v43, %v107_v44  ;;  %v1824_v16 = vcombine.low %v86_v7, %v90_v8  ;;  %v1841_v24 = vcombine.high %v102_v19, %v106_v20  ;;  %v1840_v28 = vcombine.low %v102_v19, %v106_v20  ;;  %v126_v36 = vld [vmem:[#allocation2 + $0x1c8] sm:$0xff] }
  0x43   :  { %v1847_v34 = vcombine.high %v109_v29, %v113_v30  ;;  %v117_v37 = vld [vmem:[#allocation2 + $0x180] sm:$0xff]  ;;  %v1846_v40 = vcombine.low %v109_v29, %v113_v30  ;;  %v1851_v57 = vcombine.high %v111_v51, %v115_v52  ;;  %v119_v61 = vld [vmem:[#allocation2 + $0x190] sm:$0xff]  ;;  %v1850_v63 = vcombine.low %v111_v51, %v115_v52  ;;  %v118_v29 = vld [vmem:[#allocation2 + $0x188] sm:$0xff] }
  0x44   :  { %500 = vmatpush1.bf16.msra.mxu1 %v1822_v14  ;;  %v121_v38 = vld [vmem:[#allocation2 + $0x1a0] sm:$0xff]  ;;  %582 = vmatpush1.bf16.msra.mxu0 %v1826_v39  ;;  %v123_v62 = vld [vmem:[#allocation2 + $0x1b0] sm:$0xff]  ;;  %v98_v14 = vld [vmem:[#allocation2 + $0xe8] sm:$0xff] }
  0x45   :  { %501 = vmatprep.subr.bf16.mxu1 %v1831_v15  ;;  %v1855_v42 = vcombine.high %v117_v37, %v121_v38  ;;  %v125_v45 = vld [vmem:[#allocation2 + $0x1c0] sm:$0xff]  ;;  %v1854_v48 = vcombine.low %v117_v37, %v121_v38  ;;  %583 = vmatprep.subr.bf16.mxu0 %v1835_v41  ;;  %v1859_v4 = vcombine.high %v119_v61, %v123_v62  ;;  %v127_v5 = vld [vmem:[#allocation2 + $0x1d0] sm:$0xff]  ;;  %v122_v30 = vld [vmem:[#allocation2 + $0x1a8] sm:$0xff] }
  0x46   :  { %v129_v46 = vld [vmem:[#allocation2 + $0x1e0] sm:$0xff]  ;;  %v131_v6 = vld [vmem:[#allocation2 + $0x1f0] sm:$0xff]  ;;  %v1858_v9 = vcombine.low %v119_v61, %v123_v62  ;;  %v1833_v18 = vcombine.high %v94_v13, %v98_v14  ;;  %v1832_v22 = vcombine.low %v94_v13, %v98_v14  ;;  %v130_v37 = vld [vmem:[#allocation2 + $0x1e8] sm:$0xff]  ;;  %v1857_v38 = vcombine.high %v118_v29, %v122_v30 }
  0x47   :  { %v1863_v50 = vcombine.high %v125_v45, %v129_v46  ;;  %v1862_v56 = vcombine.low %v125_v45, %v129_v46  ;;  %v2428_v1 = vld [vmem:[%s2482_s0] sm:$0xf]  ;;  %v1867_v11 = vcombine.high %v127_v5, %v131_v6  ;;  %v1866_v15 = vcombine.low %v127_v5, %v131_v6  ;;  %v2085_v17 = vld [vmem:[#allocation4 + $0x104] ss:$8 sps:$4 sm:$0xff]   ;;  %v2091_v23 = vld [vmem:[#allocation4 + $0x114] ss:$8 sps:$4 sm:$0xff]  }
  0x48   :  { %502 = vmatpush1.bf16.msra.mxu1 %v1830_v21  ;;  %584 = vmatpush1.bf16.msra.mxu0 %v1834_v47  ;;  %v2083_v21 = vld [vmem:[#allocation4 + $0x100] ss:$8 sps:$4 sm:$0xff]   ;;  %v2089_v27 = vld [vmem:[#allocation4 + $0x110] ss:$8 sps:$4 sm:$0xff]   ;;  %v2097_v31 = vld [vmem:[#allocation4 + $0x124] ss:$8 sps:$4 sm:$0xff]   ;;  %v1856_v41 = vcombine.low %v118_v29, %v122_v30  ;;  %v1865_v44 = vcombine.high %v126_v36, %v130_v37  ;;  %v1864_v47 = vcombine.low %v126_v36, %v130_v37 }
  0x49   :  { %503 = vmatprep.subr.bf16.mxu1 %v1839_v25  ;;  %585 = vmatprep.subr.bf16.mxu0 %v1843_v49  ;;  %v110_v25 = vld [vmem:[#allocation2 + $0x148] sm:$0xff]  ;;  %v2101_v39 = vld [vmem:[#allocation4 + $0x130] ss:$8 sps:$4 sm:$0xff]   ;;  %v2115_v46 = vld [vmem:[#allocation4 + $0x154] ss:$8 sps:$4 sm:$0xff]  }
  0x4a   :  { %v2095_v33 = vld [vmem:[#allocation4 + $0x120] ss:$8 sps:$4 sm:$0xff]   ;;  %v1848_v35 = vcombine.low %v110_v25, %v114_v26  ;;  %v76_v43 = vld [vmem:[#allocation2 + $0x38] sm:$0xff]  ;;  %v2067_v20 = vld [vmem:[#allocation4 + $0x24] ss:$8 sps:$4 sm:$0xff]  }
  0x4b   :  { %v2107_v45 = vld [vmem:[#allocation4 + $0x140] ss:$8 sps:$4 sm:$0xff]   ;;  %v84_v49 = vld [vmem:[#allocation2 + $0x78] sm:$0xff]  ;;  %v2088_v36 = vld [vmem:[#allocation4 + $0x84] ss:$8 sps:$4 sm:$0xff]  }
  0x4c   :  { %504 = vmatpush1.bf16.msra.mxu1 %v1838_v32  ;;  %586 = vmatpush1.bf16.msra.mxu0 %v1842_v55  ;;  %v1849_v32 = vcombine.high %v110_v25, %v114_v26  ;;  %v2113_v51 = vld [vmem:[#allocation4 + $0x150] ss:$8 sps:$4 sm:$0xff]   ;;  %v2071_v25 = vld [vmem:[#allocation4 + $0x40] ss:$8 sps:$4 sm:$0xff]   ;;  %v2076_v26 = vld [vmem:[#allocation4 + $0x54] ss:$8 sps:$4 sm:$0xff]  }
  0x4d   :  { %505 = vmatprep.subr.bf16.mxu1 %v1847_v34  ;;  %587 = vmatprep.subr.bf16.mxu0 %v1851_v57  ;;  %v2103_v34 = vld [vmem:[#allocation4 + $0x134] ss:$8 sps:$4 sm:$0xff]   ;;  %v2062_v19 = vld [vmem:[#allocation4 + $0x10] ss:$8 sps:$4 sm:$0xff]   ;;  %v2119_v29 = vld [vmem:[#allocation4 + $0x160] ss:$8 sps:$4 sm:$0xff]  }
  0x4e   :  { %v88_v53 = vld [vmem:[#allocation2 + $0x98] sm:$0xff]  ;;  %v2077_v30 = vld [vmem:[#allocation4 + $0x60] ss:$8 sps:$4 sm:$0xff]  }
  0x4f   :  { %v92_v54 = vld [vmem:[#allocation2 + $0xb8] sm:$0xff]  ;;  %v2131_v37 = vld [vmem:[#allocation4 + $0x180] ss:$8 sps:$4 sm:$0xff]  }
  0x50   :  { %506 = vmatpush1.bf16.msra.mxu1 %v1846_v40  ;;  %588 = vmatpush1.bf16.msra.mxu0 %v1850_v63  ;;  %v2109_v40 = vld [vmem:[#allocation4 + $0x144] ss:$8 sps:$4 sm:$0xff]   ;;  %v96_v57 = vld [vmem:[#allocation2 + $0xd8] sm:$0xff]  ;;  %v1829_v59 = vcombine.high %v88_v53, %v92_v54  ;;  %v1828_v60 = vcombine.low %v88_v53, %v92_v54 }
  0x51   :  { %507 = vmatprep.subr.bf16.mxu1 %v1855_v42  ;;  %589 = vmatprep.subr.bf16.mxu0 %v1859_v4  ;;  %v72_v42 = vld [vmem:[#allocation2 + $0x18] sm:$0xff]  ;;  %v2112_v54 = vld [vmem:[#allocation4 + $0xc4] ss:$8 sps:$4 sm:$0xff]  }
  0x52   :  { %v1812_v52 = vcombine.low %v72_v42, %v76_v43  ;;  %v104_v61 = vld [vmem:[#allocation2 + $0x118] sm:$0xff] }
  0x53   :  { %v108_v62 = vld [vmem:[#allocation2 + $0x138] sm:$0xff] }
  0x54   :  { %508 = vmatpush1.bf16.msra.mxu1 %v1854_v48  ;;  %590 = vmatpush1.bf16.msra.mxu0 %v1858_v9  ;;  %v80_v48 = vld [vmem:[#allocation2 + $0x58] sm:$0xff]  ;;  %v1845_v5 = vcombine.high %v104_v61, %v108_v62  ;;  %v1844_v6 = vcombine.low %v104_v61, %v108_v62  ;;  %v2149_v61 = vld [vmem:[#allocation4 + $0x1e0] ss:$8 sps:$4 sm:$0xff]  }
  0x55   :  { %509 = vmatprep.subr.bf16.mxu1 %v1863_v50  ;;  %591 = vmatprep.subr.bf16.mxu0 %v1867_v11  ;;  %v1813_v50 = vcombine.high %v72_v42, %v76_v43  ;;  %v1821_v55 = vcombine.high %v80_v48, %v84_v49  ;;  %v116_v4 = vld [vmem:[#allocation2 + $0x178] sm:$0xff]  ;;  %v2137_v43 = vld [vmem:[#allocation4 + $0x1a0] ss:$8 sps:$4 sm:$0xff]  }
  0x56   :  { %v120_v7 = vld [vmem:[#allocation2 + $0x198] sm:$0xff]  ;;  %v2122_v62 = vld [vmem:[#allocation4 + $0xe0] ss:$8 sps:$4 sm:$0xff]  }
  0x57   :  { %v124_v8 = vld [vmem:[#allocation2 + $0x1b8] sm:$0xff] }
  0x58   :  { %510 = vmatpush1.bf16.msra.mxu1 %v1862_v56  ;;  %592 = vmatpush1.bf16.msra.mxu0 %v1866_v15  ;;  %v1820_v56 = vcombine.low %v80_v48, %v84_v49  ;;  %v132_v11 = vld [vmem:[#allocation2 + $0x1f8] sm:$0xff]  ;;  %v1860_v13 = vcombine.low %v120_v7, %v124_v8  ;;  %v2098_v48 = vld [vmem:[#allocation4 + $0xa0] ss:$8 sps:$4 sm:$0xff]   ;;  %v2145_v49 = vld [vmem:[#allocation4 + $0x1c4] ss:$8 sps:$4 sm:$0xff]  }
  0x59   :  { %536 = vmatprep.subr.bf16.mxu1 %v1809_v58  ;;  %1496 = vmatprep.subr.bf16.mxu0 %v2085_v17  ;;  %v100_v58 = vld [vmem:[#allocation2 + $0xf8] sm:$0xff]  ;;  %v2059_v17 = vld [vmem:[#allocation4] ss:$8 sps:$4 sm:$0xff]  }
  0x5a   :  { %v1837_v63 = vcombine.high %v96_v57, %v100_v58  ;;  %v2094_v42 = vld [vmem:[#allocation4 + $0x94] ss:$8 sps:$4 sm:$0xff]  }
  0x5b   :  { %528 = vmatmul.mubr.bf16.vlgmr.msra.gmra.mrb[0].mxu1 %v2428_v1  ;;  %610 = vmatmul.mubr.bf16.vlgmr.msra.gmra.mrb[0].mxu0 %v2428_v1  ;;  %v2148_v53 = vld [vmem:[#allocation4 + $0x1d4] ss:$8 sps:$4 sm:$0xff]  }
  0x5c   :  { %537 = vmatpush1.bf16.msra.mxu1 %v1808_v2  ;;  %568 = vmatprep.mubr.bf16.mxu1 %v2346_v0  ;;  %v1836_v2 = vcombine.low %v96_v57, %v100_v58  ;;  %v2118_v57 = vld [vmem:[#allocation4 + $0xd4] ss:$8 sps:$4 sm:$0xff]   ;;  %v2116_v58 = vld [vmem:[#allocation4 + $0xd0] ss:$8 sps:$4 sm:$0xff]  }
  0x5d   :  { %538 = vmatprep.subr.bf16.mxu1 %v1817_v3  ;;  %1497 = vmatpush1.bf16.msra.mxu0 %v2083_v21  ;;  %v112_v3 = vld [vmem:[#allocation2 + $0x158] sm:$0xff]  ;;  %v2065_v21 = vld [vmem:[#allocation4 + $0x20] ss:$8 sps:$4 sm:$0xff]  }
  0x5e   :  { %1498 = vmatprep.subr.bf16.mxu0 %v2091_v23  ;;  %v1852_v9 = vcombine.low %v112_v3, %v116_v4  ;;  %v2068_v23 = vld [vmem:[#allocation4 + $0x30] ss:$8 sps:$4 sm:$0xff]  }
  0x60   :  { %539 = vmatpush1.bf16.msra.mxu1 %v1816_v10  ;;  %v128_v10 = vld [vmem:[#allocation2 + $0x1d8] sm:$0xff] }
  0x61   :  { %540 = vmatprep.subr.bf16.mxu1 %v1825_v12  ;;  %1499 = vmatpush1.bf16.msra.mxu0 %v2089_v27  ;;  %v1861_v12 = vcombine.high %v120_v7, %v124_v8  ;;  %v1869_v14 = vcombine.high %v128_v10, %v132_v11  ;;  %v1868_v15 = vcombine.low %v128_v10, %v132_v11  ;;  %v2074_v27 = vld [vmem:[#allocation4 + $0x50] ss:$8 sps:$4 sm:$0xff]  }
  0x62   :  { %1500 = vmatprep.subr.bf16.mxu0 %v2097_v31  ;;  %v2127_v31 = vld [vmem:[#allocation4 + $0x174] ss:$8 sps:$4 sm:$0xff]  }
  0x64   :  { %541 = vmatpush1.bf16.msra.mxu1 %v1824_v16  ;;  %v2061_v16 = vld [vmem:[#allocation4 + $0x4] ss:$8 sps:$4 sm:$0xff]  }
  0x65   :  { %542 = vmatprep.subr.bf16.mxu1 %v1833_v18  ;;  %1501 = vmatpush1.bf16.msra.mxu0 %v2095_v33  ;;  %v2064_v18 = vld [vmem:[#allocation4 + $0x14] ss:$8 sps:$4 sm:$0xff]   ;;  %v2125_v33 = vld [vmem:[#allocation4 + $0x170] ss:$8 sps:$4 sm:$0xff]  }
  0x66   :  { %1502 = vmatprep.subr.bf16.mxu0 %v2103_v34  ;;  %v2080_v34 = vld [vmem:[#allocation4 + $0x70] ss:$8 sps:$4 sm:$0xff]  }
  0x68   :  { %543 = vmatpush1.bf16.msra.mxu1 %v1832_v22  ;;  %v2070_v22 = vld [vmem:[#allocation4 + $0x34] ss:$8 sps:$4 sm:$0xff]  }
  0x69   :  { %544 = vmatprep.subr.bf16.mxu1 %v1841_v24  ;;  %1503 = vmatpush1.bf16.msra.mxu0 %v2101_v39  ;;  %v2073_v24 = vld [vmem:[#allocation4 + $0x44] ss:$8 sps:$4 sm:$0xff]   ;;  %v2136_v39 = vld [vmem:[#allocation4 + $0x194] ss:$8 sps:$4 sm:$0xff]  }
  0x6a   :  { %1504 = vmatprep.subr.bf16.mxu0 %v2109_v40  ;;  %v2086_v40 = vld [vmem:[#allocation4 + $0x80] ss:$8 sps:$4 sm:$0xff]  }
  0x6c   :  { %545 = vmatpush1.bf16.msra.mxu1 %v1840_v28  ;;  %v2121_v28 = vld [vmem:[#allocation4 + $0x164] ss:$8 sps:$4 sm:$0xff]  }
  0x6d   :  { %546 = vmatprep.subr.bf16.mxu1 %v1849_v32  ;;  %1505 = vmatpush1.bf16.msra.mxu0 %v2107_v45  ;;  %v2082_v32 = vld [vmem:[#allocation4 + $0x74] ss:$8 sps:$4 sm:$0xff]  }
  0x6e   :  { %1506 = vmatprep.subr.bf16.mxu0 %v2115_v46  ;;  %v2142_v45 = vld [vmem:[#allocation4 + $0x1b4] ss:$8 sps:$4 sm:$0xff]   ;;  %v2100_v46 = vld [vmem:[#allocation4 + $0xa4] ss:$8 sps:$4 sm:$0xff]  }
  0x70   :  { %547 = vmatpush1.bf16.msra.mxu1 %v1848_v35  ;;  %v2133_v35 = vld [vmem:[#allocation4 + $0x184] ss:$8 sps:$4 sm:$0xff]  }
  0x71   :  { %548 = vmatprep.subr.bf16.mxu1 %v1857_v38  ;;  %1507 = vmatpush1.bf16.msra.mxu0 %v2113_v51  ;;  %v2134_v38 = vld [vmem:[#allocation4 + $0x190] ss:$8 sps:$4 sm:$0xff]   ;;  %v2143_v51 = vld [vmem:[#allocation4 + $0x1c0] ss:$8 sps:$4 sm:$0xff]  }
  0x72   :  { %1508 = vmatprep.subr.bf16.mxu0 %v2121_v28 }
  0x74   :  { %549 = vmatpush1.bf16.msra.mxu1 %v1856_v41  ;;  %v2139_v41 = vld [vmem:[#allocation4 + $0x1a4] ss:$8 sps:$4 sm:$0xff]  }
  0x75   :  { %550 = vmatprep.subr.bf16.mxu1 %v1865_v44  ;;  %1509 = vmatpush1.bf16.msra.mxu0 %v2119_v29  ;;  %v2092_v44 = vld [vmem:[#allocation4 + $0x90] ss:$8 sps:$4 sm:$0xff]  }
  0x76   :  { %1510 = vmatprep.subr.bf16.mxu0 %v2127_v31 }
  0x78   :  { %551 = vmatpush1.bf16.msra.mxu1 %v1864_v47  ;;  %v2140_v47 = vld [vmem:[#allocation4 + $0x1b0] ss:$8 sps:$4 sm:$0xff]  }
  0x79   :  { %618 = vmatprep.subr.bf16.mxu1 %v1813_v50  ;;  %1511 = vmatpush1.bf16.msra.mxu0 %v2125_v33  ;;  %v2106_v50 = vld [vmem:[#allocation4 + $0xb4] ss:$8 sps:$4 sm:$0xff]  }
  0x7a   :  { %1512 = vmatprep.subr.bf16.mxu0 %v2133_v35 }
  0x7b   :  { %569 = vmatmul.mubr.bf16.vlgmr.msra.gmra.mrb[4].mxu1 %v2428_v1 }
  0x7c   :  { %619 = vmatpush1.bf16.msra.mxu1 %v1812_v52  ;;  %650 = vmatprep.mubr.bf16.mxu1 %v2346_v0  ;;  %v1853_v0 = vcombine.high %v112_v3, %v116_v4  ;;  %v2104_v52 = vld [vmem:[#allocation4 + $0xb0] ss:$8 sps:$4 sm:$0xff]  }
  0x7d   :  { %620 = vmatprep.subr.bf16.mxu1 %v1821_v55  ;;  %1513 = vmatpush1.bf16.msra.mxu0 %v2131_v37  ;;  %v2146_v55 = vld [vmem:[#allocation4 + $0x1d0] ss:$8 sps:$4 sm:$0xff]  }
  0x7e   :  { %1514 = vmatprep.subr.bf16.mxu0 %v2136_v39  ;;  %v2152_v3 = vld [vmem:[#allocation4 + $0x1f0] ss:$8 sps:$4 sm:$0xff]  }
  0x7f   :  { %v2128_v4 = vld [vmem:[#allocation4 + $0xf0] ss:$8 sps:$4 sm:$0xff]  }
  0x80   :  { %621 = vmatpush1.bf16.msra.mxu1 %v1820_v56  ;;  %v2110_v56 = vld [vmem:[#allocation4 + $0xc0] ss:$8 sps:$4 sm:$0xff]  }
  0x81   :  { %622 = vmatprep.subr.bf16.mxu1 %v1829_v59  ;;  %1515 = vmatpush1.bf16.msra.mxu0 %v2134_v38  ;;  %v2151_v59 = vld [vmem:[#allocation4 + $0x1e4] ss:$8 sps:$4 sm:$0xff]  }
  0x82   :  { %1516 = vmatprep.subr.bf16.mxu0 %v2139_v41 }
  0x84   :  { %623 = vmatpush1.bf16.msra.mxu1 %v1828_v60  ;;  %v2124_v60 = vld [vmem:[#allocation4 + $0xe4] ss:$8 sps:$4 sm:$0xff]  }
  0x85   :  { %624 = vmatprep.subr.bf16.mxu1 %v1837_v63  ;;  %1517 = vmatpush1.bf16.msra.mxu0 %v2137_v43  ;;  %v2154_v63 = vld [vmem:[#allocation4 + $0x1f4] ss:$8 sps:$4 sm:$0xff]  }
  0x86   :  { %1518 = vmatprep.subr.bf16.mxu0 %v2142_v45  ;;  %v2160_v45 = vld [vmem:[#allocation4 + $0x214] ss:$8 sps:$4 sm:$0xff]  }
  0x88   :  { %625 = vmatpush1.bf16.msra.mxu1 %v1836_v2  ;;  %v2130_v2 = vld [vmem:[#allocation4 + $0xf4] ss:$8 sps:$4 sm:$0xff]  }
  0x89   :  { %626 = vmatprep.subr.bf16.mxu1 %v1845_v5  ;;  %1519 = vmatpush1.bf16.msra.mxu0 %v2140_v47  ;;  %v2157_v5 = vld [vmem:[#allocation4 + $0x204] ss:$8 sps:$4 sm:$0xff]  }
  0x8a   :  { %1520 = vmatprep.subr.bf16.mxu0 %v2145_v49  ;;  %v2163_v47 = vld [vmem:[#allocation4 + $0x224] ss:$8 sps:$4 sm:$0xff]   ;;  %v2166_v49 = vld [vmem:[#allocation4 + $0x234] ss:$8 sps:$4 sm:$0xff]  }
  0x8c   :  { %627 = vmatpush1.bf16.msra.mxu1 %v1844_v6  ;;  %v135_v6 = vlaneseq }
  0x8d   :  { %628 = vmatprep.subr.bf16.mxu1 %v1853_v0  ;;  %1521 = vmatpush1.bf16.msra.mxu0 %v2143_v51  ;;  %v2442_v0 = vld [vmem:[%s2484_s2] sm:$0xff] }
  0x8e   :  { %1522 = vmatprep.subr.bf16.mxu0 %v2148_v53  ;;  %v2436_v7 = vshrl.u32 %v135_v6, 7  ;;  %v2169_v51 = vld [vmem:[#allocation4 + $0x244] ss:$8 sps:$4 sm:$0xff]   ;;  %v2172_v53 = vld [vmem:[#allocation4 + $0x254] ss:$8 sps:$4 sm:$0xff]  }
  0x8f   :  { %v2185_v6 = vld [vmem:[#allocation4 + $0x2a0] ss:$8 sps:$4 sm:$0xff]  }
  0x90   :  { %629 = vmatpush1.bf16.msra.mxu1 %v1852_v9  ;;  %v137_v8 = vsub.s32 0, %v2436_v7  ;;  %v141_v9 = vsub.s32 1, %v2436_v7  ;;  %v149_v28 = vsub.s32 3, %v2436_v7 }
  0x91   :  { %630 = vmatprep.subr.bf16.mxu1 %v1861_v12  ;;  %1523 = vmatpush1.bf16.msra.mxu0 %v2146_v55  ;;  %v2175_v55 = vld [vmem:[#allocation4 + $0x264] ss:$8 sps:$4 sm:$0xff]  }
  0x92   :  { %1524 = vmatprep.subr.bf16.mxu0 %v2151_v59  ;;  %v138_v10 = vrot.slane %v2442_v0, %v137_v8  ;;  %v142_v11 = vrot.slane %v2442_v0, %v141_v9 }
  0x94   :  { %631 = vmatpush1.bf16.msra.mxu1 %v1860_v13 }
  0x95   :  { %632 = vmatprep.subr.bf16.mxu1 %v1869_v14  ;;  %1525 = vmatpush1.bf16.msra.mxu0 %v2149_v61 }
  0x96   :  { %1526 = vmatprep.subr.bf16.mxu0 %v2154_v63 }
  0x98   :  { %633 = vmatpush1.bf16.msra.mxu1 %v1868_v15 }
  0x99   :  { %1455 = vmatprep.subr.bf16.mxu1 %v2061_v16  ;;  %1527 = vmatpush1.bf16.msra.mxu0 %v2152_v3  ;;  %v2184_v3 = vld [vmem:[#allocation4 + $0x294] ss:$8 sps:$4 sm:$0xff]  }
  0x9a   :  { %1537 = vmatprep.subr.bf16.mxu0 %v2157_v5  ;;  %v2187_v5 = vld [vmem:[#allocation4 + $0x2a4] ss:$8 sps:$4 sm:$0xff]  }
  0x9b   :  { %651 = vmatmul.mubr.bf16.vlgmr.msra.gmra.mrb[8].mxu1 %v2428_v1  ;;  %v2079_v1 = vld [vmem:[#allocation4 + $0x64] ss:$8 sps:$4 sm:$0xff]  }
  0x9c   :  { %1456 = vmatpush1.bf16.msra.mxu1 %v2059_v17 }
  0x9d   :  { %1457 = vmatprep.subr.bf16.mxu1 %v2064_v18 }
  0xa0   :  { %1458 = vmatpush1.bf16.msra.mxu1 %v2062_v19 }
  0xa1   :  { %1459 = vmatprep.subr.bf16.mxu1 %v2067_v20 }
  0xa4   :  { %1460 = vmatpush1.bf16.msra.mxu1 %v2065_v21 }
  0xa5   :  { %1461 = vmatprep.subr.bf16.mxu1 %v2070_v22 }
  0xa8   :  { %1462 = vmatpush1.bf16.msra.mxu1 %v2068_v23 }
  0xa9   :  { %1463 = vmatprep.subr.bf16.mxu1 %v2073_v24 }
  0xac   :  { %1464 = vmatpush1.bf16.msra.mxu1 %v2071_v25 }
  0xad   :  { %1465 = vmatprep.subr.bf16.mxu1 %v2076_v26  ;;  %v157_v26 = vsub.s32 5, %v2436_v7 }
  0xb0   :  { %1466 = vmatpush1.bf16.msra.mxu1 %v2074_v27  ;;  %v145_v27 = vsub.s32 2, %v2436_v7 }
  0xb1   :  { %1467 = vmatprep.subr.bf16.mxu1 %v2079_v1  ;;  %v158_v1 = vrot.slane %v2442_v0, %v157_v26  ;;  %v2251_v26 = vld [vmem:[#allocation6 + $0x40] sm:$0xff]  }
  0xb2   :  { %v146_v29 = vrot.slane %v2442_v0, %v145_v27  ;;  %v2252_v27 = vld [vmem:[#allocation6] sm:$0xff]  }
  0xb4   :  { %1468 = vmatpush1.bf16.msra.mxu1 %v2077_v30  ;;  %v150_v30 = vrot.slane %v2442_v0, %v149_v28  ;;  %v2253_v28 = vld [vmem:[#allocation6 + $0x48] sm:$0xff]  }
  0xb5   :  { %1469 = vmatprep.subr.bf16.mxu1 %v2082_v32 }
  0xb8   :  { %1470 = vmatpush1.bf16.msra.mxu1 %v2080_v34 }
  0xb9   :  { %1471 = vmatprep.subr.bf16.mxu1 %v2088_v36 }
  0xbc   :  { %1472 = vmatpush1.bf16.msra.mxu1 %v2086_v40 }
  0xbd   :  { %1473 = vmatprep.subr.bf16.mxu1 %v2094_v42  ;;  %v2155_v42 = vld [vmem:[#allocation4 + $0x200] ss:$8 sps:$4 sm:$0xff]  }
  0xc0   :  { %1474 = vmatpush1.bf16.msra.mxu1 %v2092_v44 }
  0xc1   :  { %1475 = vmatprep.subr.bf16.mxu1 %v2100_v46  ;;  %v2158_v46 = vld [vmem:[#allocation4 + $0x210] ss:$8 sps:$4 sm:$0xff]  }
  0xc4   :  { %1476 = vmatpush1.bf16.msra.mxu1 %v2098_v48  ;;  %v2161_v48 = vld [vmem:[#allocation4 + $0x220] ss:$8 sps:$4 sm:$0xff]  }
  0xc5   :  { %1477 = vmatprep.subr.bf16.mxu1 %v2106_v50  ;;  %v2164_v50 = vld [vmem:[#allocation4 + $0x230] ss:$8 sps:$4 sm:$0xff]  }
  0xc8   :  { %1478 = vmatpush1.bf16.msra.mxu1 %v2104_v52  ;;  %v2167_v52 = vld [vmem:[#allocation4 + $0x240] ss:$8 sps:$4 sm:$0xff]  }
  0xc9   :  { %1479 = vmatprep.subr.bf16.mxu1 %v2112_v54  ;;  %v2170_v54 = vld [vmem:[#allocation4 + $0x250] ss:$8 sps:$4 sm:$0xff]  }
  0xcc   :  { %1480 = vmatpush1.bf16.msra.mxu1 %v2110_v56  ;;  %v2173_v56 = vld [vmem:[#allocation4 + $0x260] ss:$8 sps:$4 sm:$0xff]  }
  0xcd   :  { %1481 = vmatprep.subr.bf16.mxu1 %v2118_v57  ;;  %v2178_v57 = vld [vmem:[#allocation4 + $0x274] ss:$8 sps:$4 sm:$0xff]  }
  0xd0   :  { %1482 = vmatpush1.bf16.msra.mxu1 %v2116_v58 }
  0xd1   :  { %1483 = vmatprep.subr.bf16.mxu1 %v2124_v60  ;;  %v2176_v60 = vld [vmem:[#allocation4 + $0x270] ss:$8 sps:$4 sm:$0xff]  }
  0xd4   :  { %1484 = vmatpush1.bf16.msra.mxu1 %v2122_v62  ;;  %v2181_v62 = vld [vmem:[#allocation4 + $0x284] ss:$8 sps:$4 sm:$0xff]  }
  0xd5   :  { %1485 = vmatprep.subr.bf16.mxu1 %v2130_v2  ;;  %v2179_v2 = vld [vmem:[#allocation4 + $0x280] ss:$8 sps:$4 sm:$0xff]  }
  0xd8   :  { %1486 = vmatpush1.bf16.msra.mxu1 %v2128_v4  ;;  %v2182_v4 = vld [vmem:[#allocation4 + $0x290] ss:$8 sps:$4 sm:$0xff]  }
  0xd9   :  { %2015 = vmatprep.subr.bf16.mxu1 %v2251_v26  ;;  %v2265_v26 = vld [vmem:[#allocation6 + $0x78] sm:$0xff]  }
 0x12e   :  { %v529_v12 = vpop.f32.mrb[0].mxu1  ;;  %v2451_v22 = vpop.f32.mrb[0].mxu0 }
 0x12f   :  { %v530_v13 = vadd.f32 %v529_v12, %v138_v10  ;;  %v531_v14 = vpop.f32.mrb[1].mxu1  ;;  %v613_v23 = vpop.f32.mrb[1].mxu0  ;;  %v2190_v10 = vld [vmem:[#allocation4 + $0x2b4] ss:$8 sps:$4 sm:$0xff]   ;;  %v2193_v12 = vld [vmem:[#allocation4 + $0x2c4] ss:$8 sps:$4 sm:$0xff]  }
 0x130   :  { %v532_v15 = vadd.f32 %v531_v14, %v142_v11  ;;  %v533_v16 = vpop.f32.mrb[2].mxu1  ;;  %v615_v24 = vpop.f32.mrb[2].mxu0  ;;  %v614_v31 = vadd.f32 %v613_v23, %v158_v1  ;;  %v2188_v11 = vld [vmem:[#allocation4 + $0x2b0] ss:$8 sps:$4 sm:$0xff]   ;;  %v2191_v14 = vld [vmem:[#allocation4 + $0x2c0] ss:$8 sps:$4 sm:$0xff]  }
 0x131   :  { %v659_v17 = vmax.f32 %v530_v13, 0.0  ;;  %v534_v18 = vpop.f32.mrb[3].mxu1  ;;  %v616_v25 = vpop.f32.mrb[3].mxu0  ;;  %v153_v13 = vsub.s32 4, %v2436_v7  ;;  %v2196_v16 = vld [vmem:[#allocation4 + $0x2d4] ss:$8 sps:$4 sm:$0xff]  }
 0x132   :  { %v660_v19 = vmax.f32 %v532_v15, 0.0  ;;  %v664_v37 = vmax.f32 %v614_v31, 0.0  ;;  %v165_v15 = vsub.s32 7, %v2436_v7  ;;  %v2194_v18 = vld [vmem:[#allocation4 + $0x2d0] ss:$8 sps:$4 sm:$0xff]   ;;  %v2254_v31 = vld [vmem:[#allocation6 + $0x8] sm:$0xff]  }
 0x133   :  { %v667_v20 = vpack.c.bf16 %v659_v17, %v659_v17  ;;  %v154_v17 = vrot.slane %v2442_v0, %v153_v13  ;;  %v2197_v23 = vld [vmem:[#allocation4 + $0x2e0] ss:$8 sps:$4 sm:$0xff]   ;;  %v2202_v24 = vld [vmem:[#allocation4 + $0x2f4] ss:$8 sps:$4 sm:$0xff]   ;;  %v2247_v13 = vld [vmem:[#allocation4 + $0x3e4] ss:$8 sps:$4 sm:$0xff]  }
 0x134   :  { %v668_v21 = vpack.c.bf16 %v660_v19, %v660_v19  ;;  %v672_v43 = vpack.c.bf16 %v664_v37, %v664_v37  ;;  %v166_v19 = vrot.slane %v2442_v0, %v165_v15  ;;  %v2256_v37 = vld [vmem:[#allocation6 + $0x10] sm:$0xff]  }
 0x136   :  { %1487 = vmatprep.mubr.bf16.mxu1 %v668_v21  ;;  %v612_v21 = vadd.f32 %v2451_v22, %v154_v17  ;;  %v2248_v17 = vld [vmem:[#allocation4 + $0x3f0] ss:$8 sps:$4 sm:$0xff]  }
 0x137   :  { %1488 = vmatmul.mubr.bf16.vlgmr.msra.gmra.mrb[12].mxu1 %v667_v20  ;;  %v2199_v20 = vld [vmem:[#allocation4 + $0x2e4] ss:$8 sps:$4 sm:$0xff]  }
 0x138   :  { %v663_v1 = vmax.f32 %v612_v21, 0.0  ;;  %2016 = vmatpush3.bf16.msra.mxu1 %v2252_v27  ;;  %v2266_v27 = vld [vmem:[#allocation6 + $0x38] sm:$0xff]  }
 0x139   :  { %2017 = vmatprep.subr.bf16.mxu1 %v2253_v28 }
 0x13a   :  { %v671_v22 = vpack.c.bf16 %v663_v1, %v663_v1 }
 0x13c   :  { %2018 = vmatpush3.bf16.msra.mxu1 %v2254_v31 }
 0x14e   :  { %v570_v32 = vpop.f32.mrb[4].mxu1 }
 0x14f   :  { %v571_v33 = vadd.f32 %v570_v32, %v146_v29  ;;  %v572_v34 = vpop.f32.mrb[5].mxu1  ;;  %v2200_v29 = vld [vmem:[#allocation4 + $0x2f0] ss:$8 sps:$4 sm:$0xff]   ;;  %v2205_v32 = vld [vmem:[#allocation4 + $0x304] ss:$8 sps:$4 sm:$0xff]  }
 0x150   :  { %v573_v35 = vadd.f32 %v572_v34, %v150_v30  ;;  %v574_v36 = vpop.f32.mrb[6].mxu1  ;;  %v2203_v34 = vld [vmem:[#allocation4 + $0x300] ss:$8 sps:$4 sm:$0xff]  }
 0x151   :  { %v661_v38 = vmax.f32 %v571_v33, 0.0  ;;  %v575_v39 = vpop.f32.mrb[7].mxu1  ;;  %v2255_v33 = vld [vmem:[#allocation6 + $0x50] sm:$0xff]  }
 0x152   :  { %v662_v40 = vmax.f32 %v573_v35, 0.0  ;;  %v2208_v36 = vld [vmem:[#allocation4 + $0x314] ss:$8 sps:$4 sm:$0xff]   ;;  %2019 = vmatprep.subr.bf16.mxu1 %v2255_v33  ;;  %v2206_v39 = vld [vmem:[#allocation4 + $0x310] ss:$8 sps:$4 sm:$0xff]  }
 0x153   :  { %v669_v44 = vpack.c.bf16 %v661_v38, %v661_v38  ;;  %v2257_v38 = vld [vmem:[#allocation6 + $0x58] sm:$0xff]   ;;  %2020 = vmatpush3.bf16.msra.mxu1 %v2256_v37 }
 0x154   :  { %v670_v41 = vpack.c.bf16 %v662_v40, %v662_v40  ;;  %v2211_v40 = vld [vmem:[#allocation4 + $0x324] ss:$8 sps:$4 sm:$0xff]   ;;  %2021 = vmatprep.subr.bf16.mxu1 %v2257_v38 }
 0x156   :  { %1528 = vmatprep.mubr.bf16.mxu0 %v670_v41  ;;  %v2258_v41 = vld [vmem:[#allocation6 + $0x18] sm:$0xff]  }
 0x157   :  { %1529 = vmatmul.mubr.bf16.vlgmr.msra.gmra.mrb[4].mxu0 %v669_v44  ;;  %v2214_v44 = vld [vmem:[#allocation4 + $0x334] ss:$8 sps:$4 sm:$0xff]   ;;  %2022 = vmatpush3.bf16.msra.mxu1 %v2258_v41 }
 0x158   :  { %1538 = vmatpush1.bf16.msra.mxu0 %v2155_v42  ;;  %1569 = vmatprep.mubr.bf16.mxu0 %v672_v43  ;;  %v2259_v42 = vld [vmem:[#allocation6 + $0x60] sm:$0xff]  }
 0x159   :  { %1539 = vmatprep.subr.bf16.mxu0 %v2160_v45  ;;  %v2209_v43 = vld [vmem:[#allocation4 + $0x320] ss:$8 sps:$4 sm:$0xff]   ;;  %2023 = vmatprep.subr.bf16.mxu1 %v2259_v42 }
 0x15a   :  { %v2260_v45 = vld [vmem:[#allocation6 + $0x20] sm:$0xff]  }
 0x15b   :  { %2024 = vmatpush3.bf16.msra.mxu1 %v2260_v45 }
 0x15c   :  { %1540 = vmatpush1.bf16.msra.mxu0 %v2158_v46  ;;  %v2261_v46 = vld [vmem:[#allocation6 + $0x68] sm:$0xff]  }
 0x15d   :  { %1541 = vmatprep.subr.bf16.mxu0 %v2163_v47  ;;  %v2212_v47 = vld [vmem:[#allocation4 + $0x330] ss:$8 sps:$4 sm:$0xff]   ;;  %2025 = vmatprep.subr.bf16.mxu1 %v2261_v46 }
 0x160   :  { %1542 = vmatpush1.bf16.msra.mxu0 %v2161_v48  ;;  %v2217_v48 = vld [vmem:[#allocation4 + $0x344] ss:$8 sps:$4 sm:$0xff]  }
 0x161   :  { %1543 = vmatprep.subr.bf16.mxu0 %v2166_v49  ;;  %v2262_v49 = vld [vmem:[#allocation6 + $0x28] sm:$0xff]  }
 0x162   :  { %2026 = vmatpush3.bf16.msra.mxu1 %v2262_v49 }
 0x164   :  { %1544 = vmatpush1.bf16.msra.mxu0 %v2164_v50  ;;  %v2215_v50 = vld [vmem:[#allocation4 + $0x340] ss:$8 sps:$4 sm:$0xff]  }
 0x165   :  { %1545 = vmatprep.subr.bf16.mxu0 %v2169_v51  ;;  %v2220_v51 = vld [vmem:[#allocation4 + $0x354] ss:$8 sps:$4 sm:$0xff]  }
 0x168   :  { %1546 = vmatpush1.bf16.msra.mxu0 %v2167_v52  ;;  %v2218_v52 = vld [vmem:[#allocation4 + $0x350] ss:$8 sps:$4 sm:$0xff]  }
 0x169   :  { %1547 = vmatprep.subr.bf16.mxu0 %v2172_v53  ;;  %v2223_v53 = vld [vmem:[#allocation4 + $0x364] ss:$8 sps:$4 sm:$0xff]  }
 0x16c   :  { %1548 = vmatpush1.bf16.msra.mxu0 %v2170_v54  ;;  %v2221_v54 = vld [vmem:[#allocation4 + $0x360] ss:$8 sps:$4 sm:$0xff]  }
 0x16d   :  { %1549 = vmatprep.subr.bf16.mxu0 %v2175_v55  ;;  %v2226_v55 = vld [vmem:[#allocation4 + $0x374] ss:$8 sps:$4 sm:$0xff]  }
 0x16e   :  { %v2459_v58 = vpop.f32.mrb[8].mxu1 }
 0x16f   :  { %v654_v59 = vpop.f32.mrb[9].mxu1 }
 0x170   :  { %1550 = vmatpush1.bf16.msra.mxu0 %v2173_v56  ;;  %v656_v61 = vpop.f32.mrb[10].mxu1  ;;  %v655_v25 = vadd.f32 %v654_v59, %v166_v19  ;;  %v2224_v56 = vld [vmem:[#allocation4 + $0x370] ss:$8 sps:$4 sm:$0xff]   ;;  %v2227_v59 = vld [vmem:[#allocation4 + $0x380] ss:$8 sps:$4 sm:$0xff]  }
 0x171   :  { %1551 = vmatprep.subr.bf16.mxu0 %v2178_v57  ;;  %v657_v63 = vpop.f32.mrb[11].mxu1  ;;  %v2229_v57 = vld [vmem:[#allocation4 + $0x384] ss:$8 sps:$4 sm:$0xff]   ;;  %v2230_v61 = vld [vmem:[#allocation4 + $0x390] ss:$8 sps:$4 sm:$0xff]  }
 0x172   :  { %v666_v30 = vmax.f32 %v655_v25, 0.0  ;;  %v2233_v63 = vld [vmem:[#allocation4 + $0x3a0] ss:$8 sps:$4 sm:$0xff]   ;;  %v2264_v25 = vld [vmem:[#allocation6 + $0x30] sm:$0xff]  }
 0x174   :  { %1552 = vmatpush1.bf16.msra.mxu0 %v2176_v60  ;;  %v674_v35 = vpack.c.bf16 %v666_v30, %v666_v30  ;;  %v2232_v60 = vld [vmem:[#allocation4 + $0x394] ss:$8 sps:$4 sm:$0xff]  }
 0x175   :  { %1553 = vmatprep.subr.bf16.mxu0 %v2181_v62  ;;  %v2235_v62 = vld [vmem:[#allocation4 + $0x3a4] ss:$8 sps:$4 sm:$0xff]  }
 0x178   :  { %1554 = vmatpush1.bf16.msra.mxu0 %v2179_v2  ;;  %v2238_v2 = vld [vmem:[#allocation4 + $0x3b4] ss:$8 sps:$4 sm:$0xff]  }
 0x179   :  { %1555 = vmatprep.subr.bf16.mxu0 %v2184_v3  ;;  %v2236_v3 = vld [vmem:[#allocation4 + $0x3b0] ss:$8 sps:$4 sm:$0xff]  }
 0x17c   :  { %1556 = vmatpush1.bf16.msra.mxu0 %v2182_v4  ;;  %v2241_v4 = vld [vmem:[#allocation4 + $0x3c4] ss:$8 sps:$4 sm:$0xff]  }
 0x17d   :  { %1557 = vmatprep.subr.bf16.mxu0 %v2187_v5  ;;  %v2239_v5 = vld [vmem:[#allocation4 + $0x3c0] ss:$8 sps:$4 sm:$0xff]  }
 0x180   :  { %1558 = vmatpush1.bf16.msra.mxu0 %v2185_v6  ;;  %v161_v6 = vsub.s32 6, %v2436_v7  ;;  %v1998_v7 = vld [vmem:[%s2488_s6] ss:$0 sm:$0xff] }
 0x181   :  { %1559 = vmatprep.subr.bf16.mxu0 %v2190_v10  ;;  %v2244_v10 = vld [vmem:[#allocation4 + $0x3d4] ss:$8 sps:$4 sm:$0xff]  }
 0x184   :  { %1560 = vmatpush1.bf16.msra.mxu0 %v2188_v11  ;;  %v2242_v11 = vld [vmem:[#allocation4 + $0x3d0] ss:$8 sps:$4 sm:$0xff]  }
 0x185   :  { %1561 = vmatprep.subr.bf16.mxu0 %v2193_v12  ;;  %v162_v12 = vrot.slane %v2442_v0, %v161_v6  ;;  %v2263_v0 = vld [vmem:[#allocation6 + $0x70] sm:$0xff]  }
 0x186   :  { %2027 = vmatprep.subr.bf16.mxu1 %v2263_v0 }
 0x187   :  { %v653_v15 = vadd.f32 %v2459_v58, %v162_v12  ;;  %2028 = vmatpush3.bf16.msra.mxu1 %v2264_v25  ;;  %v803_v58 = vld [vmem:[%s2486_s4] sm:$0x3] }
 0x188   :  { %1562 = vmatpush1.bf16.msra.mxu0 %v2191_v14  ;;  %v2245_v14 = vld [vmem:[#allocation4 + $0x3e0] ss:$8 sps:$4 sm:$0xff]   ;;  %2029 = vmatprep.subr.bf16.mxu1 %v2265_v26  ;;  %v808_v28 = vrot.slane %v803_v58, %v137_v8  ;;  %v812_v1 = vrot.slane %v803_v58, %v141_v9 }
 0x189   :  { %1563 = vmatprep.subr.bf16.mxu0 %v2196_v16  ;;  %v2250_v16 = vld [vmem:[#allocation4 + $0x3f4] ss:$8 sps:$4 sm:$0xff]  }
 0x18b   :  { %2030 = vmatpush3.bf16.msra.mxu1 %v2266_v27 }
 0x18c   :  { %1564 = vmatpush1.bf16.msra.mxu0 %v2194_v18  ;;  %v665_v18 = vmax.f32 %v653_v15, 0.0 }
 0x18d   :  { %1565 = vmatprep.subr.bf16.mxu0 %v2199_v20 }
 0x18e   :  { %v673_v19 = vpack.c.bf16 %v665_v18, %v665_v18 }
 0x190   :  { %1566 = vmatpush1.bf16.msra.mxu0 %v2197_v23 }
 0x191   :  { %1567 = vmatprep.subr.bf16.mxu0 %v2202_v24 }
 0x194   :  { %1568 = vmatpush1.bf16.msra.mxu0 %v2200_v29 }
 0x195   :  { %1578 = vmatprep.subr.bf16.mxu0 %v2205_v32 }
 0x197   :  { %1570 = vmatmul.mubr.bf16.vlgmr.msra.gmra.mrb[4].mxu0 %v671_v22 }
 0x198   :  { %1579 = vmatpush1.bf16.msra.mxu0 %v2203_v34  ;;  %1610 = vmatprep.mubr.bf16.mxu0 %v674_v35 }
 0x199   :  { %1580 = vmatprep.subr.bf16.mxu0 %v2208_v36 }
 0x19c   :  { %1581 = vmatpush1.bf16.msra.mxu0 %v2206_v39 }
 0x19d   :  { %1582 = vmatprep.subr.bf16.mxu0 %v2211_v40 }
 0x1a0   :  { %1583 = vmatpush1.bf16.msra.mxu0 %v2209_v43 }
 0x1a1   :  { %1584 = vmatprep.subr.bf16.mxu0 %v2214_v44 }
 0x1a4   :  { %1585 = vmatpush1.bf16.msra.mxu0 %v2212_v47 }
 0x1a5   :  { %1586 = vmatprep.subr.bf16.mxu0 %v2217_v48 }
 0x1a8   :  { %1587 = vmatpush1.bf16.msra.mxu0 %v2215_v50 }
 0x1a9   :  { %1588 = vmatprep.subr.bf16.mxu0 %v2220_v51 }
 0x1ac   :  { %1589 = vmatpush1.bf16.msra.mxu0 %v2218_v52 }
 0x1ad   :  { %1590 = vmatprep.subr.bf16.mxu0 %v2223_v53 }
 0x1b0   :  { %1591 = vmatpush1.bf16.msra.mxu0 %v2221_v54 }
 0x1b1   :  { %1592 = vmatprep.subr.bf16.mxu0 %v2226_v55 }
 0x1b4   :  { %1593 = vmatpush1.bf16.msra.mxu0 %v2224_v56 }
 0x1b5   :  { %1594 = vmatprep.subr.bf16.mxu0 %v2229_v57 }
 0x1b8   :  { %1595 = vmatpush1.bf16.msra.mxu0 %v2227_v59 }
 0x1b9   :  { %1596 = vmatprep.subr.bf16.mxu0 %v2232_v60 }
 0x1bc   :  { %1597 = vmatpush1.bf16.msra.mxu0 %v2230_v61 }
 0x1bd   :  { %1598 = vmatprep.subr.bf16.mxu0 %v2235_v62 }
 0x1c0   :  { %1599 = vmatpush1.bf16.msra.mxu0 %v2233_v63 }
 0x1c1   :  { %1600 = vmatprep.subr.bf16.mxu0 %v2238_v2 }
 0x1c4   :  { %1601 = vmatpush1.bf16.msra.mxu0 %v2236_v3 }
 0x1c5   :  { %1602 = vmatprep.subr.bf16.mxu0 %v2241_v4 }
 0x1c8   :  { %1603 = vmatpush1.bf16.msra.mxu0 %v2239_v5 }
 0x1c9   :  { %1604 = vmatprep.subr.bf16.mxu0 %v2244_v10 }
 0x1cc   :  { %1605 = vmatpush1.bf16.msra.mxu0 %v2242_v11 }
 0x1cd   :  { %1606 = vmatprep.subr.bf16.mxu0 %v2247_v13 }
 0x1d0   :  { %1607 = vmatpush1.bf16.msra.mxu0 %v2245_v14 }
 0x1d1   :  { %1608 = vmatprep.subr.bf16.mxu0 %v2250_v16 }
 0x1d4   :  { %1609 = vmatpush1.bf16.msra.mxu0 %v2248_v17 }
 0x1d7   :  { %1611 = vmatmul.mubr.bf16.vlgmr.msra.gmra.mrb[4].mxu0 %v673_v19 }
 0x20a   :  { %v1489_v20 = vpop.f32.mrb[12].mxu1 }
 0x20b   :  { %v1491_v21 = vpop.f32.mrb[13].mxu1  ;;  %v1490_v29 = vadd.f32 %v1489_v20, %v808_v28 }
 0x20c   :  { %v1493_v23 = vpop.f32.mrb[14].mxu1  ;;  %v1492_v30 = vadd.f32 %v1491_v21, %v812_v1 }
 0x20d   :  { %v1494_v24 = vpop.f32.mrb[15].mxu1 }
 0x2aa   :  { %v1612_v31 = vpop.f32.mrb[4].mxu0 }
 0x2ab   :  { %v2038_v32 = vadd.f32 %v1612_v31, %v1490_v29  ;;  %v1614_v33 = vpop.f32.mrb[5].mxu0 }
 0x2ac   :  { %v2040_v22 = vadd.f32 %v1614_v33, %v1492_v30  ;;  %v1616_v34 = vpop.f32.mrb[6].mxu0 }
 0x2ad   :  { %v1619_v35 = vmax.f32 %v2038_v32, 0.0  ;;  %v1617_v36 = vpop.f32.mrb[7].mxu0 }
 0x2ae   :  { %v1620_v37 = vmax.f32 %v2040_v22, 0.0 }
 0x2af   :  { %v1621_v39 = vpack.c.bf16 %v1619_v35, %v1619_v35 }
 0x2b0   :  { %v1622_v38 = vpack.c.bf16 %v1620_v37, %v1620_v37 }
 0x2b2   :  { %1790 = vmatprep.mubr.bf16.mxu1 %v1622_v38 }
 0x2b3   :  { %1791 = vmatmul.mubr.bf16.vlgmr.msra.gmra.mrb[16].mxu1 %v1621_v39 }
 0x386   :  { %v2031_v40 = vpop.f32.mrb[16].mxu1 }
 0x387   :  { %v2032_v8 = vpop.f32.mrb[17].mxu1 }
 0x388   :  { %v2033_v9 = vadd.f32 %v2032_v8, %v2031_v40  ;;  %v2034_v41 = vpop.f32.mrb[18].mxu1 }
 0x389   :  { %v2035_v42 = vpop.f32.mrb[19].mxu1 }
 0x38a   :  { %v1793_v43 = vadd.f32 %v2033_v9, %v1998_v7 }
 0x38c   :  { %v1798_v44 = vpack.c.bf16 %v1793_v43, %v1793_v43 }
 0x38e   :  { %1799 = vst [vmem:[%s2489_s7] sm:$0xf] %v1798_v44 }
 0x38f   :  { %1804 = vsyncpa [#allocation3], 1 }
 0x390   :  { %1805 = vsyncpa [#allocation5], 1 }

</bundles_post_ra>
